<compile_context>
chip_gen: v6e
topology: v6e:2x2x1
jax: 0.10.0
libtpu: 0.0.40
codegen_flags: <defaults>
</compile_context>

<pallas_src>
import functools

import jax
import jax.numpy as jnp
from jax import lax
from jax.experimental import pallas as pl
from jax.experimental.pallas import tpu as pltpu


def _regret_loss_kernel(pred_ref, perf_ref, labels_ref, out_ref, acc_ref,
                        *, batch_size, tile_b):
    i = pl.program_id(0)

    @pl.when(i == 0)
    def _init():
        acc_ref[0] = jnp.float32(0.0)

    # Blocks are lane-dense (A, TILE_B): algorithms on sublanes, batch on lanes.
    # Upcast inside the kernel so narrow dtypes stay narrow on the HBM wire but the
    # reduction accumulates in f32.
    pred = pred_ref[...].astype(jnp.float32)     # (A, TILE_B)
    perf = perf_ref[...].astype(jnp.float32)     # (A, TILE_B)
    labels = labels_ref[...]                     # (1, TILE_B) int32

    a, tb = pred.shape
    # One-hot gather of performances[b, labels[b]] via sublane iota == labels.
    row_ids = lax.broadcasted_iota(jnp.int32, (a, tb), 0)
    term = perf * pred - jnp.where(row_ids == labels, perf, 0.0)

    # Mask lanes past the real batch (padding of a partial last tile).
    col_ids = lax.broadcasted_iota(jnp.int32, (a, tb), 1) + i * tile_b
    term = jnp.where(col_ids < batch_size, term, 0.0)

    acc_ref[0] += jnp.sum(term)

    @pl.when(i == pl.num_programs(0) - 1)
    def _finish():
        out_ref[0, 0] = acc_ref[0] / jnp.float32(batch_size)


def _pick_tile_b(batch, num_alg, itemsize):
    # (8,128) rule: lane (last) block dim must be a multiple of 128 or equal B.
    if batch % 128 != 0:
        return batch
    # Keep 2 inputs x 2 pipeline buffers x (A * TILE_B * itemsize) well under the
    # scoped-VMEM default on every generation (v7x has the smallest VMEM).
    budget_per_block = 2 * 1024 * 1024
    tile = (budget_per_block // (num_alg * itemsize)) // 128 * 128
    return int(max(128, min(batch, tile)))


def regret_loss(pred, labels, performances, *, tile_b=None):
    """pred: (B, A), labels: (B,) int, performances: (B, A) -> scalar f32 loss."""
    B, A = pred.shape
    itemsize = jnp.dtype(pred.dtype).itemsize
    if tile_b is None:
        tile_b = _pick_tile_b(B, A, itemsize)

    # Lane-dense layout: (A, B) so the (large) batch axis maps onto the 128 lanes.
    pred_t = pred.T
    perf_t = performances.T
    labels_row = labels.astype(jnp.int32).reshape(1, B)

    num_tiles = pl.cdiv(B, tile_b)
    kernel = functools.partial(_regret_loss_kernel, batch_size=B, tile_b=tile_b)

    out = pl.pallas_call(
        kernel,
        out_shape=jax.ShapeDtypeStruct((1, 1), jnp.float32),
        grid_spec=pltpu.PrefetchScalarGridSpec(
            num_scalar_prefetch=0,
            grid=(num_tiles,),
            in_specs=[
                pl.BlockSpec((A, tile_b), lambda i: (0, i)),
                pl.BlockSpec((A, tile_b), lambda i: (0, i)),
                pl.BlockSpec((1, tile_b), lambda i: (0, i)),
            ],
            out_specs=pl.BlockSpec((1, 1), lambda i: (0, 0),
                                   memory_space=pltpu.MemorySpace.SMEM),
            scratch_shapes=[pltpu.SMEM((1,), jnp.float32)],
        ),
        compiler_params=pltpu.CompilerParams(
            dimension_semantics=("arbitrary",)),
        cost_estimate=pl.CostEstimate(
            flops=3 * B * A,
            transcendentals=0,
            bytes_accessed=2 * B * A * itemsize + B * 4 + 4),
    )(pred_t, perf_t, labels_row)
    return out[0, 0]


def regret_loss_ref(pred, labels, performances):
    """Pure-JAX reference matching the PyTorch code literally (incl. (B,B) broadcast)."""
    pred_perf = jnp.sum(performances * pred, axis=1, keepdims=True)   # (B, 1)
    gathered = performances[jnp.arange(labels.shape[0]), labels]      # (B,)
    losses = pred_perf + (-gathered)                                  # (B, B)
    return jnp.mean(losses)


if __name__ == "__main__":
    key = jax.random.PRNGKey(0)
    k1, k2, k3, k4, k5, k6 = jax.random.split(key, 6)

    # Small case: batch of 8 instances, 32 candidate algorithms.
    B, A = 8, 32
    pred = jax.nn.softmax(jax.random.normal(k1, (B, A), dtype=jnp.float32), axis=1)
    perf = jax.random.uniform(k2, (B, A), dtype=jnp.float32)
    labels = jax.random.randint(k3, (B,), 0, A, dtype=jnp.int32)

    loss = jax.block_until_ready(regret_loss(pred, labels, perf))
    ref = regret_loss_ref(pred, labels, perf)
    assert jnp.allclose(loss, ref, atol=1e-5, rtol=1e-5), (loss, ref)

    # Multi-tile case: exercises batch tiling, accumulation and tail-lane masking.
    B2, A2 = 320, 48
    pred2 = jax.nn.softmax(jax.random.normal(k4, (B2, A2), dtype=jnp.float32), axis=1)
    perf2 = jax.random.uniform(k5, (B2, A2), dtype=jnp.float32)
    labels2 = jax.random.randint(k6, (B2,), 0, A2, dtype=jnp.int32)

    loss2 = jax.block_until_ready(regret_loss(pred2, labels2, perf2, tile_b=128))
    ref2 = regret_loss_ref(pred2, labels2, perf2)
    assert jnp.allclose(loss2, ref2, atol=1e-5, rtol=1e-5), (loss2, ref2)

    print("KERNEL_OK")
</pallas_src>

<mosaic_0001>
module attributes {stable_mosaic.version = 11 : i64} {
  func.func @_regret_loss_kernel(%arg0: i32, %arg1: memref<32x8xf32, #tpu.memory_space<vmem>>, %arg2: memref<32x8xf32, #tpu.memory_space<vmem>>, %arg3: memref<1x8xi32, #tpu.memory_space<vmem>>, %arg4: memref<1x1xf32, #tpu.memory_space<smem>>, %arg5: memref<1xf32, #tpu.memory_space<smem>>) attributes {dimension_semantics = [#tpu.dimension_semantics<arbitrary>], iteration_bounds = array<i64: 1>, scalar_prefetch = 0 : i64, scratch_operands = 1 : i64, tpu.core_type = #tpu.core_type<tc>, window_params = [{transform_indices = @transform_0, window_bounds = array<i64: 32, 8>}, {transform_indices = @transform_1, window_bounds = array<i64: 32, 8>}, {transform_indices = @transform_2, window_bounds = array<i64: 1, 8>}, {transform_indices = @transform_3, window_bounds = array<i64: 1, 1>}]} {
    %c0_i32 = arith.constant 0 : i32
    %0 = arith.cmpi eq, %arg0, %c0_i32 : i32
    %1 = arith.extui %0 : i1 to i32
    %c0_i32_0 = arith.constant 0 : i32
    %2 = arith.cmpi ne, %1, %c0_i32_0 : i32
    scf.if %2 {
      %cst_13 = arith.constant 0.000000e+00 : f32
      %c0_14 = arith.constant 0 : index
      %31 = memref.load %arg5[%c0_14] : memref<1xf32, #tpu.memory_space<smem>>
      memref.store %cst_13, %arg5[%c0_14] : memref<1xf32, #tpu.memory_space<smem>>
    } else {
    }
    %c0 = arith.constant 0 : index
    %c0_1 = arith.constant 0 : index
    %3 = vector.load %arg1[%c0, %c0_1] : memref<32x8xf32, #tpu.memory_space<vmem>>, vector<32x8xf32>
    %c0_2 = arith.constant 0 : index
    %c0_3 = arith.constant 0 : index
    %4 = vector.load %arg2[%c0_2, %c0_3] : memref<32x8xf32, #tpu.memory_space<vmem>>, vector<32x8xf32>
    %c0_4 = arith.constant 0 : index
    %c0_5 = arith.constant 0 : index
    %5 = vector.load %arg3[%c0_4, %c0_5] : memref<1x8xi32, #tpu.memory_space<vmem>>, vector<1x8xi32>
    %6 = tpu.iota {dimensions = array<i32: 0>} : vector<32x8xi32>
    %7 = arith.mulf %4, %3 : vector<32x8xf32>
    %8 = vector.broadcast %5 : vector<1x8xi32> to vector<32x8xi32>
    %9 = arith.cmpi eq, %6, %8 : vector<32x8xi32>
    %cst = arith.constant 0.000000e+00 : f32
    %10 = vector.broadcast %cst : f32 to vector<32x8xf32>
    %11 = arith.select %9, %4, %10 : vector<32x8xi1>, vector<32x8xf32>
    %12 = arith.subf %7, %11 : vector<32x8xf32>
    %13 = tpu.iota {dimensions = array<i32: 1>} : vector<32x8xi32>
    %c8_i32 = arith.constant 8 : i32
    %14 = arith.muli %arg0, %c8_i32 : i32
    %15 = vector.broadcast %14 : i32 to vector<32x8xi32>
    %16 = arith.addi %13, %15 : vector<32x8xi32>
    %c8_i32_6 = arith.constant 8 : i32
    %17 = vector.broadcast %c8_i32_6 : i32 to vector<32x8xi32>
    %18 = arith.cmpi slt, %16, %17 : vector<32x8xi32>
    %cst_7 = arith.constant 0.000000e+00 : f32
    %19 = vector.broadcast %cst_7 : f32 to vector<32x8xf32>
    %20 = arith.select %18, %12, %19 : vector<32x8xi1>, vector<32x8xf32>
    %c0_8 = arith.constant 0 : index
    %21 = memref.load %arg5[%c0_8] : memref<1xf32, #tpu.memory_space<smem>>
    %22 = vector.shape_cast %20 : vector<32x8xf32> to vector<1x32x8xf32>
    %cst_9 = arith.constant dense<0.000000e+00> : vector<1xf32>
    %23 = vector.multi_reduction <add>, %22, %cst_9 [1, 2] : vector<1x32x8xf32> to vector<1xf32>
    %24 = vector.shape_cast %23 : vector<1xf32> to vector<1x1x1xf32>
    %25 = vector.extract %24[0, 0, 0] : f32 from vector<1x1x1xf32>
    %26 = arith.addf %21, %25 : f32
    %c0_10 = arith.constant 0 : index
    %27 = memref.load %arg5[%c0_10] : memref<1xf32, #tpu.memory_space<smem>>
    memref.store %26, %arg5[%c0_10] : memref<1xf32, #tpu.memory_space<smem>>
    %c0_i32_11 = arith.constant 0 : i32
    %28 = arith.cmpi eq, %arg0, %c0_i32_11 : i32
    %29 = arith.extui %28 : i1 to i32
    %c0_i32_12 = arith.constant 0 : i32
    %30 = arith.cmpi ne, %29, %c0_i32_12 : i32
    scf.if %30 {
      %c0_13 = arith.constant 0 : index
      %31 = memref.load %arg5[%c0_13] : memref<1xf32, #tpu.memory_space<smem>>
      %cst_14 = arith.constant 8.000000e+00 : f32
      %32 = arith.divf %31, %cst_14 : f32
      %c0_15 = arith.constant 0 : index
      %c0_16 = arith.constant 0 : index
      %33 = memref.load %arg4[%c0_15, %c0_16] : memref<1x1xf32, #tpu.memory_space<smem>>
      memref.store %32, %arg4[%c0_15, %c0_16] : memref<1x1xf32, #tpu.memory_space<smem>>
    } else {
    }
    return
  }
  func.func @transform_0(%arg0: i32) -> (i32, i32) {
    %c0_i32 = arith.constant 0 : i32
    %c0_i32_0 = arith.constant 0 : i32
    return %c0_i32, %arg0 : i32, i32
  }
  func.func @transform_1(%arg0: i32) -> (i32, i32) {
    %c0_i32 = arith.constant 0 : i32
    %c0_i32_0 = arith.constant 0 : i32
    return %c0_i32, %arg0 : i32, i32
  }
  func.func @transform_2(%arg0: i32) -> (i32, i32) {
    %c0_i32 = arith.constant 0 : i32
    %c0_i32_0 = arith.constant 0 : i32
    return %c0_i32, %arg0 : i32, i32
  }
  func.func @transform_3(%arg0: i32) -> (i32, i32) {
    %c0_i32 = arith.constant 0 : i32
    %c0_i32_0 = arith.constant 0 : i32
    %c0_i32_1 = arith.constant 0 : i32
    return %c0_i32, %c0_i32_0 : i32, i32
  }
}

</mosaic_0001>

<bundles_post_ra>
// kernel: tpu_custom_call.1
= control target key start
LH: loop header
LB: loop body
LE: loop exit
PB: predicated region body
PF: predicated region fallthrough
CT: control target
= control target key end

     0   :  { %v30_v3 = vlaneseq  ;;  %s181_s0 = inlined_call_operand.vmem [shape: f32[32,8], index: 0, kind: input, shape index: {}]   ;;  %s182_s1 = inlined_call_operand.vmem [shape: f32[32,8], index: 1, kind: input, shape index: {}]   ;;  %s183_s2 = inlined_call_operand.vmem [shape: s32[1,8], index: 2, kind: input, shape index: {}]   ;;  %s184_s3 = inlined_call_operand.hbm [shape: f32[1,1], index: 3, kind: output, shape index: {}]  }
   0x1   :  { %v21_v0 = vld [vmem:[%s181_s0] sm:$0xff]  ;;  %v22_v1 = vld [vmem:[%s181_s0 + $0x8] sm:$0xff]  ;;  %v23_v2 = vld [vmem:[%s181_s0 + $0x10] sm:$0xff] }
   0x2   :  { %v24_v4 = vld [vmem:[%s181_s0 + $0x18] sm:$0xff]  ;;  %v25_v5 = vld [vmem:[%s182_s1] sm:$0xff]  ;;  %v26_v6 = vld [vmem:[%s182_s1 + $0x8] sm:$0xff]  ;;  %v31_v10 = vshrl.u32 %v30_v3, 7  ;;  %v56_v12 = vand.u32 127, %v30_v3 }
   0x3   :  { %v27_v7 = vld [vmem:[%s182_s1 + $0x10] sm:$0xff]  ;;  %v28_v8 = vld [vmem:[%s182_s1 + $0x18] sm:$0xff]  ;;  %v108_v9 = vld [vmem:[%s183_s2] ss:$0 sm:$0xff]  ;;  %v35_v11 = vmul.f32 %v25_v5, %v21_v0  ;;  %v36_v13 = vmul.f32 %v26_v6, %v22_v1 }
   0x4   :  { %v37_v14 = vmul.f32 %v27_v7, %v23_v2  ;;  %v38_v15 = vmul.f32 %v28_v8, %v24_v4 }
   0x5   :  { %8 = vsyncpa [#allocation4], 0  ;;  %v32_v16 = vadd.s32 8, %v31_v10  ;;  %v33_v17 = vadd.s32 16, %v31_v10  ;;  %v34_v18 = vadd.s32 24, %v31_v10  ;;  %vm43_vm0 = vcmp.eq.s32.totalorder %v31_v10, %v108_v9  ;;  %s122_s2 = smov [#allocation3]  }
   0x6   :  { %v47_v19 = vsel %vm43_vm0, %v25_v5, 0.0  ;;  %vm60_vm1 = vcmp.lt.s32.totalorder %v56_v12, 8  ;;  %vm66_vm2 = vcmask 64512  }
   0x7   :  { %vm44_vm3 = vcmp.eq.s32.totalorder %v32_v16, %v108_v9  ;;  %vm45_vm4 = vcmp.eq.s32.totalorder %v33_v17, %v108_v9  ;;  %vm46_vm5 = vcmp.eq.s32.totalorder %v34_v18, %v108_v9  ;;  %v51_v20 = vsub.f32 %v35_v11, %v47_v19 }
   0x8   :  { %v48_v21 = vsel %vm44_vm3, %v26_v6, 0.0  ;;  %v49_v22 = vsel %vm45_vm4, %v27_v7, 0.0  ;;  %v50_v23 = vsel %vm46_vm5, %v28_v8, 0.0 }
   0x9   :  { %v52_v24 = vsub.f32 %v36_v13, %v48_v21  ;;  %v53_v25 = vsub.f32 %v37_v14, %v49_v22  ;;  %v54_v26 = vsub.f32 %v38_v15, %v50_v23  ;;  %v61_v27 = vsel %vm60_vm1, %v51_v20, 0.0 }
   0xa   :  { %v67_v28 = vsel %vm66_vm2, %v61_v27, 0.0 }
   0xb   :  { %v62_v29 = vsel %vm60_vm1, %v52_v24, 0.0  ;;  %v63_v30 = vsel %vm60_vm1, %v53_v25, 0.0  ;;  %v64_v31 = vsel %vm60_vm1, %v54_v26, 0.0 }
   0xc   :  { %v68_v32 = vsel %vm66_vm2, %v62_v29, 0.0  ;;  %v70_v33 = vsel %vm66_vm2, %v63_v30, 0.0  ;;  %v72_v35 = vsel %vm66_vm2, %v64_v31, 0.0 }
   0xd   :  { %v69_v34 = vadd.f32 %v68_v32, %v67_v28 }
   0xf   :  { %v71_v36 = vadd.f32 %v70_v33, %v69_v34 }
  0x11   :  { %v73_v37 = vadd.f32 %v72_v35, %v71_v36 }
  0x13   :  { %74 = vadd.xlane.f32.xlu0 %v73_v37 }
  0x9c   :  { %v75_v38 = vpop.xlane.xlu0 %74 }
  0x9d   :  { %v76_v39 = vrot.slane %v75_v38, 4 }
  0x9f   :  { %v77_v40 = vadd.f32 %v76_v39, %v75_v38 }
  0xa1   :  { %v78_v41 = vrot.slane %v77_v40, 2 }
  0xa3   :  { %v79_v42 = vadd.f32 %v78_v41, %v77_v40 }
  0xa5   :  { %v80_v43 = vrot.slane %v79_v42, 1 }
  0xa7   :  { %v81_v44 = vadd.f32 %v80_v43, %v79_v42 }
  0xa9   :  { %109 = vpush %v81_v44 }
  0xda   :  { %s110_s0 = spop %109 }
  0xdb   :  { %s92_s1 = smul.f32 0.125, %s110_s0 }
  0xdd   :  { %94 = sst [smem:[#allocation3]] %s92_s1 }
  0xde   :  { %102 = dma.smem_to_hbm %s122_s2, 16, %s184_s3, [#allocation4]  }
  0xdf   :  { %120 = dma.done.wait [#allocation4], 16  }
  0xe0   :  { %121 = vsyncadd [#allocation4], 4294967280 }
  0xe1   :  { %106 = sfence }
  0xe2   :  { %107 = vsyncpa [#allocation4], 1 }

</bundles_post_ra>
